<compile_context>
chip_gen: v7x
topology: tpu7x:2x2x1
jax: 0.10.0
libtpu: 0.0.40
codegen_flags: <defaults>
</compile_context>

<pallas_src>
import numpy as np
import jax
import jax.numpy as jnp
from jax.experimental import pallas as pl
from jax.experimental.pallas import tpu as pltpu

POOL_K = 2          # MaxPool1d(kernel_size=2, stride=2), floor mode
LANE = 128          # TPU lane width
CHUNK = 512         # in-kernel lane sub-tile (keeps intermediates in vregs)

_TILE_CANDIDATES = (16384, 8192, 4096, 2048, 1024, 512, 256, 128)
_TILE_VMEM_BUDGET = 8 * 1024 * 1024   # budget for double-buffered x + out blocks


def fused_kernel(x_ref, w_ref, b_ref, o_ref):
    # x_ref: (C, TL)        tile of the original (B, C, L) input (batch squeezed)
    # w_ref: (f2, C)        Linear weight, rows pre-permuted so pooling pair
    #                       (2i, 2i+1) lives at rows (i, n_win + i)
    # b_ref: (f2, 1)        bias, same permutation (always f32)
    # o_ref: (1, TL)        lane-dense output row (one value per position)
    w = w_ref[...]
    b = b_ref[...].astype(jnp.float32)

    tl = x_ref.shape[1]
    chunk = min(CHUNK, tl)
    n_chunks = tl // chunk
    half = w.shape[0] // 2
    inv = 1.0 / half

    def compute_chunk(start):
        x_c = x_ref[:, pl.ds(start, chunk)]                        # (C, chunk)
        # v2^T = W @ x : fuses x.permute(0, 2, 1) into the MXU contraction.
        v2t = jax.lax.dot_general(
            w, x_c,
            dimension_numbers=(((1,), (0,)), ((), ())),
            preferred_element_type=jnp.float32,
        )
        v2t = v2t + b                                              # bias over lanes
        # nn.Identity and Dropout(p=0.5) in eval mode are no-ops.
        # TODO(synk): training-mode stochastic dropout not implemented (eval semantics).
        # MaxPool1d(2,2): thanks to the wrapper-side row permutation the two pool
        # operands are contiguous sublane halves -> one jnp.maximum.
        pooled = jnp.maximum(v2t[:half, :], v2t[half:, :])         # (n_win, chunk)
        # AdaptiveAvgPool1d(1): mean over pooled windows -> lane-dense row.
        mean_row = jnp.sum(pooled, axis=0, keepdims=True) * inv    # (1, chunk)
        o_ref[:, pl.ds(start, chunk)] = mean_row.astype(o_ref.dtype)

    if n_chunks == 1:
        compute_chunk(0)
    else:
        # Fully-unrolled short loop: bounded live ranges, LLO scheduler visibility.
        def body(ci, carry):
            compute_chunk(pl.multiple_of(ci * chunk, chunk))
            return carry
        jax.lax.fori_loop(0, n_chunks, body, 0, unroll=True)


def _pick_tile(l_pad, c, x_itemsize, out_itemsize, need_two_programs):
    """Largest lane tile dividing padded L that fits the double-buffer budget."""
    for t in _TILE_CANDIDATES:
        if l_pad % t != 0:
            continue
        if need_two_programs and (l_pad // t) < 2:
            continue
        if 2 * (c * t * x_itemsize) + 2 * (t * out_itemsize) <= _TILE_VMEM_BUDGET:
            return t
    return LANE


def reference_forward(x, weight, bias):
    """Pure-JAX reference (also the XLA fallback path for tiny shapes)."""
    v1 = jnp.transpose(x, (0, 2, 1))                                   # (B, L, C)
    v2 = jnp.einsum("blc,fc->blf", v1, weight,
                    precision=jax.lax.Precision.HIGHEST) + bias        # Linear
    n_win = v2.shape[-1] // POOL_K
    a = v2[..., 0:POOL_K * n_win:POOL_K]
    b = v2[..., 1:POOL_K * n_win:POOL_K]
    pooled = jnp.maximum(a, b)                                         # MaxPool1d(2,2)
    return jnp.mean(pooled, axis=-1, keepdims=True)                    # AdaptiveAvgPool1d(1)


def model_forward(x, weight, bias, *, force_pallas=False, compute_dtype=None):
    """x: (B, C, L), weight: (F, C), bias: (F,). Returns (B, L, 1)."""
    B, C, L = x.shape
    f_out = weight.shape[0]
    n_win = f_out // POOL_K
    assert n_win >= 1, "MaxPool1d(k=2) needs at least 2 features"

    # Tiny-shape short-circuit: pallas_call fixed cost dwarfs ~tens of FLOPs.
    if not force_pallas and B * L < 512:
        return reference_forward(x, weight, bias)

    # Static (numpy) pooling-pair permutation: pair (2i, 2i+1) -> rows (i, n_win+i).
    # Floor mode: an odd trailing feature is dropped, exactly like MaxPool1d.
    f2 = POOL_K * n_win
    perm = np.concatenate([np.arange(0, f2, POOL_K), np.arange(1, f2, POOL_K)])
    w_perm = weight[perm, :]                              # (f2, C)
    b_perm = bias[perm].reshape(f2, 1).astype(jnp.float32)

    # Pad L to a lane multiple; padded columns are computed then sliced off.
    l_pad = ((L + LANE - 1) // LANE) * LANE
    x_p = x if l_pad == L else jnp.pad(x, ((0, 0), (0, 0), (0, l_pad - L)))

    if compute_dtype is not None:                         # e.g. jnp.bfloat16 x/W stream
        x_p = x_p.astype(compute_dtype)
        w_perm = w_perm.astype(compute_dtype)

    x_itemsize = jnp.dtype(x_p.dtype).itemsize
    out_itemsize = jnp.dtype(x.dtype).itemsize

    # Keep >= 2 program instances when possible so both v7x TensorCores get work.
    need_two = (B == 1) and (l_pad >= 2 * LANE)
    tl = _pick_tile(l_pad, C, x_itemsize, out_itemsize, need_two)
    grid = (B, l_pad // tl)

    # VMEM budget as an explicit function of the tile: double-buffered x block,
    # out block, and the (small) weight/bias blocks, plus margin.
    block_bytes = (2 * C * tl * x_itemsize + 2 * tl * out_itemsize
                   + 2 * (f2 * C * x_itemsize + f2 * 4))
    vmem_limit = int(min(64 * 1024 * 1024,
                         max(16 * 1024 * 1024, 2 * block_bytes + 4 * 1024 * 1024)))

    out = pl.pallas_call(
        fused_kernel,
        out_shape=jax.ShapeDtypeStruct((B, 1, l_pad), x.dtype),
        grid=grid,
        in_specs=[
            pl.BlockSpec((None, C, tl), lambda b, l: (b, 0, l)),   # x tile (C, TL)
            pl.BlockSpec((f2, C), lambda b, l: (0, 0)),            # weight (whole)
            pl.BlockSpec((f2, 1), lambda b, l: (0, 0)),            # bias (whole)
        ],
        out_specs=pl.BlockSpec((None, 1, tl), lambda b, l: (b, 0, l)),
        compiler_params=pltpu.CompilerParams(
            dimension_semantics=("parallel", "parallel"),
            vmem_limit_bytes=vmem_limit,
        ),
        cost_estimate=pl.CostEstimate(
            flops=2 * B * l_pad * C * f2,
            transcendentals=0,
            bytes_accessed=(B * C * l_pad * x_itemsize + f2 * C * x_itemsize
                            + f2 * 4 + B * l_pad * out_itemsize),
        ),
    )(x_p, w_perm, b_perm)

    return out[:, 0, :L].reshape(B, L, 1)


if __name__ == "__main__":
    key = jax.random.PRNGKey(0)
    kx, kw, kb, kx2, kx3 = jax.random.split(key, 5)

    # Shape exercising the big-tile path: TL=2048, 4 unrolled chunks, grid=(2, 1).
    B, C, L, F_OUT = 2, 16, 2048, 32
    x = jax.random.normal(kx, (B, C, L), dtype=jnp.float32)
    weight = jax.random.normal(kw, (F_OUT, C), dtype=jnp.float32) * 0.5
    bias = jax.random.normal(kb, (F_OUT,), dtype=jnp.float32) * 0.1

    ref = reference_forward(x, weight, bias)
    out = jax.block_until_ready(model_forward(x, weight, bias))
    assert out.shape == (B, L, 1), out.shape
    assert jnp.allclose(out, ref, atol=5e-3, rtol=5e-3), float(jnp.max(jnp.abs(out - ref)))

    # B=1 with L not a lane multiple: padding path + keep-two-programs (v7x) path.
    L2 = 1000
    x2 = jax.random.normal(kx3, (1, C, L2), dtype=jnp.float32)
    ref2 = reference_forward(x2, weight, bias)
    out2 = jax.block_until_ready(model_forward(x2, weight, bias))
    assert out2.shape == (1, L2, 1), out2.shape
    assert jnp.allclose(out2, ref2, atol=5e-3, rtol=5e-3), float(jnp.max(jnp.abs(out2 - ref2)))

    # bf16 x/W stream (memory-bound ~2x byte reduction), f32 accumulate.
    out_bf = jax.block_until_ready(model_forward(x, weight, bias, compute_dtype=jnp.bfloat16))
    assert jnp.allclose(out_bf, ref, atol=5e-2, rtol=5e-2), float(jnp.max(jnp.abs(out_bf - ref)))

    # Exact module configuration: x1 = randn(1, 2, 2), Linear(2, 2).
    xb, cb, lb, fb = 1, 2, 2, 2
    x_s = jax.random.normal(kx2, (xb, cb, lb), dtype=jnp.float32)
    w_s = weight[:fb, :cb]
    b_s = bias[:fb]
    ref_s = reference_forward(x_s, w_s, b_s)
    out_s = jax.block_until_ready(model_forward(x_s, w_s, b_s))                      # XLA fallback
    out_sp = jax.block_until_ready(model_forward(x_s, w_s, b_s, force_pallas=True))  # Pallas path
    assert out_s.shape == (xb, lb, 1), out_s.shape
    assert jnp.allclose(out_s, ref_s, atol=1e-4, rtol=1e-4), (out_s, ref_s)
    assert jnp.allclose(out_sp, ref_s, atol=1e-4, rtol=1e-4), (out_sp, ref_s)

    print("KERNEL_OK")
</pallas_src>

<mosaic_0001>
module attributes {stable_mosaic.version = 11 : i64} {
  func.func @fused_kernel(%arg0: i32, %arg1: i32, %arg2: memref<1x16x2048xf32, #tpu.memory_space<vmem>>, %arg3: memref<32x16xf32, #tpu.memory_space<vmem>>, %arg4: memref<32x1xf32, #tpu.memory_space<vmem>>, %arg5: memref<1x1x2048xf32, #tpu.memory_space<vmem>>) attributes {dimension_semantics = [#tpu.dimension_semantics<parallel>, #tpu.dimension_semantics<parallel>], iteration_bounds = array<i64: 2, 1>, scalar_prefetch = 0 : i64, scratch_operands = 0 : i64, tpu.core_type = #tpu.core_type<tc>, window_params = [{transform_indices = @transform_0, window_bounds = array<i64: 1, 16, 2048>}, {pipeline_mode = #tpu.pipeline_mode<synchronous>, transform_indices = @transform_1, window_bounds = array<i64: 32, 16>}, {pipeline_mode = #tpu.pipeline_mode<synchronous>, transform_indices = @transform_2, window_bounds = array<i64: 32, 1>}, {transform_indices = @transform_3, window_bounds = array<i64: 1, 1, 2048>}]} {
    %c0 = arith.constant 0 : index
    %c0_0 = arith.constant 0 : index
    %0 = vector.load %arg3[%c0, %c0_0] : memref<32x16xf32, #tpu.memory_space<vmem>>, vector<32x16xf32>
    %c0_1 = arith.constant 0 : index
    %c0_2 = arith.constant 0 : index
    %1 = vector.load %arg4[%c0_1, %c0_2] : memref<32x1xf32, #tpu.memory_space<vmem>>, vector<32x1xf32>
    %c0_i32 = arith.constant 0 : i32
    %c512_i32 = arith.constant 512 : i32
    %2 = arith.muli %c0_i32, %c512_i32 : i32
    %3 = tpu.assume_multiple %2, 512 : i32
    %c0_3 = arith.constant 0 : index
    %c0_4 = arith.constant 0 : index
    %4 = arith.index_cast %3 : i32 to index
    %5 = vector.load %arg2[%c0_3, %c0_4, %4] : memref<1x16x2048xf32, #tpu.memory_space<vmem>>, vector<1x16x512xf32>
    %6 = vector.shape_cast %5 : vector<1x16x512xf32> to vector<16x512xf32>
    %cst = arith.constant dense<0.000000e+00> : vector<32x512xf32>
    %7 = tpu.matmul %0, %6, %cst {dimension_numbers = #tpu.dot_dimension_numbers<[1], [0], [0], [1], [0, 0, 1, 1], [], []>} : vector<32x16xf32>, vector<16x512xf32>, vector<32x512xf32> -> vector<32x512xf32>
    %8 = vector.broadcast %1 : vector<32x1xf32> to vector<32x512xf32>
    %9 = arith.addf %7, %8 : vector<32x512xf32>
    %10 = vector.extract_strided_slice %9 {offsets = [0, 0], sizes = [16, 512], strides = [1, 1]} : vector<32x512xf32> to vector<16x512xf32>
    %11 = vector.extract_strided_slice %9 {offsets = [16, 0], sizes = [16, 512], strides = [1, 1]} : vector<32x512xf32> to vector<16x512xf32>
    %12 = arith.maximumf %10, %11 : vector<16x512xf32>
    %cst_5 = arith.constant dense<0.000000e+00> : vector<512xf32>
    %13 = vector.multi_reduction <add>, %12, %cst_5 [0] : vector<16x512xf32> to vector<512xf32>
    %14 = vector.shape_cast %13 : vector<512xf32> to vector<1x512xf32>
    %cst_6 = arith.constant 6.250000e-02 : f32
    %15 = vector.broadcast %cst_6 : f32 to vector<1x512xf32>
    %16 = arith.mulf %14, %15 : vector<1x512xf32>
    %c0_7 = arith.constant 0 : index
    %c0_8 = arith.constant 0 : index
    %17 = arith.index_cast %3 : i32 to index
    %18 = vector.load %arg5[%c0_7, %c0_8, %17] : memref<1x1x2048xf32, #tpu.memory_space<vmem>>, vector<1x1x512xf32>
    %19 = vector.shape_cast %18 : vector<1x1x512xf32> to vector<1x512xf32>
    %20 = vector.shape_cast %16 : vector<1x512xf32> to vector<1x1x512xf32>
    tpu.vector_store %arg5[%c0_7, %c0_8, %17], %20 {strides = array<i32>} : memref<1x1x2048xf32, #tpu.memory_space<vmem>>, vector<1x1x512xf32>,
    %c1_i32 = arith.constant 1 : i32
    %c512_i32_9 = arith.constant 512 : i32
    %21 = arith.muli %c1_i32, %c512_i32_9 : i32
    %22 = tpu.assume_multiple %21, 512 : i32
    %c0_10 = arith.constant 0 : index
    %c0_11 = arith.constant 0 : index
    %23 = arith.index_cast %22 : i32 to index
    %24 = vector.load %arg2[%c0_10, %c0_11, %23] : memref<1x16x2048xf32, #tpu.memory_space<vmem>>, vector<1x16x512xf32>
    %25 = vector.shape_cast %24 : vector<1x16x512xf32> to vector<16x512xf32>
    %cst_12 = arith.constant dense<0.000000e+00> : vector<32x512xf32>
    %26 = tpu.matmul %0, %25, %cst_12 {dimension_numbers = #tpu.dot_dimension_numbers<[1], [0], [0], [1], [0, 0, 1, 1], [], []>} : vector<32x16xf32>, vector<16x512xf32>, vector<32x512xf32> -> vector<32x512xf32>
    %27 = vector.broadcast %1 : vector<32x1xf32> to vector<32x512xf32>
    %28 = arith.addf %26, %27 : vector<32x512xf32>
    %29 = vector.extract_strided_slice %28 {offsets = [0, 0], sizes = [16, 512], strides = [1, 1]} : vector<32x512xf32> to vector<16x512xf32>
    %30 = vector.extract_strided_slice %28 {offsets = [16, 0], sizes = [16, 512], strides = [1, 1]} : vector<32x512xf32> to vector<16x512xf32>
    %31 = arith.maximumf %29, %30 : vector<16x512xf32>
    %cst_13 = arith.constant dense<0.000000e+00> : vector<512xf32>
    %32 = vector.multi_reduction <add>, %31, %cst_13 [0] : vector<16x512xf32> to vector<512xf32>
    %33 = vector.shape_cast %32 : vector<512xf32> to vector<1x512xf32>
    %cst_14 = arith.constant 6.250000e-02 : f32
    %34 = vector.broadcast %cst_14 : f32 to vector<1x512xf32>
    %35 = arith.mulf %33, %34 : vector<1x512xf32>
    %c0_15 = arith.constant 0 : index
    %c0_16 = arith.constant 0 : index
    %36 = arith.index_cast %22 : i32 to index
    %37 = vector.load %arg5[%c0_15, %c0_16, %36] : memref<1x1x2048xf32, #tpu.memory_space<vmem>>, vector<1x1x512xf32>
    %38 = vector.shape_cast %37 : vector<1x1x512xf32> to vector<1x512xf32>
    %39 = vector.shape_cast %35 : vector<1x512xf32> to vector<1x1x512xf32>
    tpu.vector_store %arg5[%c0_15, %c0_16, %36], %39 {strides = array<i32>} : memref<1x1x2048xf32, #tpu.memory_space<vmem>>, vector<1x1x512xf32>,
    %c2_i32 = arith.constant 2 : i32
    %c512_i32_17 = arith.constant 512 : i32
    %40 = arith.muli %c2_i32, %c512_i32_17 : i32
    %41 = tpu.assume_multiple %40, 512 : i32
    %c0_18 = arith.constant 0 : index
    %c0_19 = arith.constant 0 : index
    %42 = arith.index_cast %41 : i32 to index
    %43 = vector.load %arg2[%c0_18, %c0_19, %42] : memref<1x16x2048xf32, #tpu.memory_space<vmem>>, vector<1x16x512xf32>
    %44 = vector.shape_cast %43 : vector<1x16x512xf32> to vector<16x512xf32>
    %cst_20 = arith.constant dense<0.000000e+00> : vector<32x512xf32>
    %45 = tpu.matmul %0, %44, %cst_20 {dimension_numbers = #tpu.dot_dimension_numbers<[1], [0], [0], [1], [0, 0, 1, 1], [], []>} : vector<32x16xf32>, vector<16x512xf32>, vector<32x512xf32> -> vector<32x512xf32>
    %46 = vector.broadcast %1 : vector<32x1xf32> to vector<32x512xf32>
    %47 = arith.addf %45, %46 : vector<32x512xf32>
    %48 = vector.extract_strided_slice %47 {offsets = [0, 0], sizes = [16, 512], strides = [1, 1]} : vector<32x512xf32> to vector<16x512xf32>
    %49 = vector.extract_strided_slice %47 {offsets = [16, 0], sizes = [16, 512], strides = [1, 1]} : vector<32x512xf32> to vector<16x512xf32>
    %50 = arith.maximumf %48, %49 : vector<16x512xf32>
    %cst_21 = arith.constant dense<0.000000e+00> : vector<512xf32>
    %51 = vector.multi_reduction <add>, %50, %cst_21 [0] : vector<16x512xf32> to vector<512xf32>
    %52 = vector.shape_cast %51 : vector<512xf32> to vector<1x512xf32>
    %cst_22 = arith.constant 6.250000e-02 : f32
    %53 = vector.broadcast %cst_22 : f32 to vector<1x512xf32>
    %54 = arith.mulf %52, %53 : vector<1x512xf32>
    %c0_23 = arith.constant 0 : index
    %c0_24 = arith.constant 0 : index
    %55 = arith.index_cast %41 : i32 to index
    %56 = vector.load %arg5[%c0_23, %c0_24, %55] : memref<1x1x2048xf32, #tpu.memory_space<vmem>>, vector<1x1x512xf32>
    %57 = vector.shape_cast %56 : vector<1x1x512xf32> to vector<1x512xf32>
    %58 = vector.shape_cast %54 : vector<1x512xf32> to vector<1x1x512xf32>
    tpu.vector_store %arg5[%c0_23, %c0_24, %55], %58 {strides = array<i32>} : memref<1x1x2048xf32, #tpu.memory_space<vmem>>, vector<1x1x512xf32>,
    %c3_i32 = arith.constant 3 : i32
    %c512_i32_25 = arith.constant 512 : i32
    %59 = arith.muli %c3_i32, %c512_i32_25 : i32
    %60 = tpu.assume_multiple %59, 512 : i32
    %c0_26 = arith.constant 0 : index
    %c0_27 = arith.constant 0 : index
    %61 = arith.index_cast %60 : i32 to index
    %62 = vector.load %arg2[%c0_26, %c0_27, %61] : memref<1x16x2048xf32, #tpu.memory_space<vmem>>, vector<1x16x512xf32>
    %63 = vector.shape_cast %62 : vector<1x16x512xf32> to vector<16x512xf32>
    %cst_28 = arith.constant dense<0.000000e+00> : vector<32x512xf32>
    %64 = tpu.matmul %0, %63, %cst_28 {dimension_numbers = #tpu.dot_dimension_numbers<[1], [0], [0], [1], [0, 0, 1, 1], [], []>} : vector<32x16xf32>, vector<16x512xf32>, vector<32x512xf32> -> vector<32x512xf32>
    %65 = vector.broadcast %1 : vector<32x1xf32> to vector<32x512xf32>
    %66 = arith.addf %64, %65 : vector<32x512xf32>
    %67 = vector.extract_strided_slice %66 {offsets = [0, 0], sizes = [16, 512], strides = [1, 1]} : vector<32x512xf32> to vector<16x512xf32>
    %68 = vector.extract_strided_slice %66 {offsets = [16, 0], sizes = [16, 512], strides = [1, 1]} : vector<32x512xf32> to vector<16x512xf32>
    %69 = arith.maximumf %67, %68 : vector<16x512xf32>
    %cst_29 = arith.constant dense<0.000000e+00> : vector<512xf32>
    %70 = vector.multi_reduction <add>, %69, %cst_29 [0] : vector<16x512xf32> to vector<512xf32>
    %71 = vector.shape_cast %70 : vector<512xf32> to vector<1x512xf32>
    %cst_30 = arith.constant 6.250000e-02 : f32
    %72 = vector.broadcast %cst_30 : f32 to vector<1x512xf32>
    %73 = arith.mulf %71, %72 : vector<1x512xf32>
    %c0_31 = arith.constant 0 : index
    %c0_32 = arith.constant 0 : index
    %74 = arith.index_cast %60 : i32 to index
    %75 = vector.load %arg5[%c0_31, %c0_32, %74] : memref<1x1x2048xf32, #tpu.memory_space<vmem>>, vector<1x1x512xf32>
    %76 = vector.shape_cast %75 : vector<1x1x512xf32> to vector<1x512xf32>
    %77 = vector.shape_cast %73 : vector<1x512xf32> to vector<1x1x512xf32>
    tpu.vector_store %arg5[%c0_31, %c0_32, %74], %77 {strides = array<i32>} : memref<1x1x2048xf32, #tpu.memory_space<vmem>>, vector<1x1x512xf32>,
    %c4_i32 = arith.constant 4 : i32
    return
  }
  func.func @transform_0(%arg0: i32, %arg1: i32) -> (i32, i32, i32) {
    %c0_i32 = arith.constant 0 : i32
    %c0_i32_0 = arith.constant 0 : i32
    return %arg0, %c0_i32, %arg1 : i32, i32, i32
  }
  func.func @transform_1(%arg0: i32, %arg1: i32) -> (i32, i32) {
    %c0_i32 = arith.constant 0 : i32
    %c0_i32_0 = arith.constant 0 : i32
    %c0_i32_1 = arith.constant 0 : i32
    return %c0_i32, %c0_i32_0 : i32, i32
  }
  func.func @transform_2(%arg0: i32, %arg1: i32) -> (i32, i32) {
    %c0_i32 = arith.constant 0 : i32
    %c0_i32_0 = arith.constant 0 : i32
    %c0_i32_1 = arith.constant 0 : i32
    return %c0_i32, %c0_i32_0 : i32, i32
  }
  func.func @transform_3(%arg0: i32, %arg1: i32) -> (i32, i32, i32) {
    %c0_i32 = arith.constant 0 : i32
    %c0_i32_0 = arith.constant 0 : i32
    return %arg0, %c0_i32, %arg1 : i32, i32, i32
  }
}

</mosaic_0001>

<bundles_post_ra>
// kernel: tpu_custom_call.1
= control target key start
LH: loop header
LB: loop body
LE: loop exit
PB: predicated region body
PF: predicated region fallthrough
CT: control target
= control target key end

     0   :  { %8 = vsyncpa [#allocation3], 0  ;;  %s2167_s0 = inlined_call_operand.hbm [shape: f32[2,16,2048], index: 0, kind: input, shape index: {}]   ;;  %s2168_s1 = inlined_call_operand.vmem [shape: f32[32,16], index: 1, kind: input, shape index: {}]   ;;  %s2169_s2 = inlined_call_operand.vmem [shape: f32[32,1], index: 2, kind: input, shape index: {}]   ;;  %s2170_s3 = inlined_call_operand.hbm [shape: f32[2,1,2048], index: 3, kind: output, shape index: {}]  }
   0x1   :  { %10 = vsyncpa [#allocation3 + $0x1], 0 }
   0x2   :  { %11 = vsyncpa [#allocation4], 0 }
   0x3   :  { %13 = vsyncpa [#allocation4 + $0x1], 0  ;;  %s1703_s12 = smov 0   ;;  %s1705_s13 = smov 0  }
   0x4   :  { %s1707_s14 = smov 0   ;;  %s1709_s15 = smov 0  }
   0x5   :  { %s1711_s16 = smov 0   ;;  %s1713_s17 = smov 0  }
   0x6 LB: > { %s1385_s18 = sadd.s32 4294967295, %s1674_s17   ;;  %s1386_s19 = sadd.s32 4294967294, %s1674_s17   ;;  %s1674_s17 = sphi %s1713_s17, %s19_s17   ;;  %s1670_s16 = sphi %s1711_s16, %s2187_s16   ;;  %s1666_s15 = sphi %s1709_s15, %s2186_s15   ;;  %s1662_s14 = sphi %s1707_s14, %s2185_s14   ;;  %s1658_s13 = sphi %s1705_s13, %s2184_s13   ;;  %s1654_s12 = sphi %s1703_s12, %s2183_s12  }
   0x7   : > { %s31_s20 = sadd.s32 1, %s1670_s16  ;;  %s40_s21 = sadd.s32 1, %s1662_s14 }
   0x8   : > { %p33_p0 = scmp.ge.s32.totalorder %s31_s20, 2  ;;  %p47_p1 = scmp.ne.s32.totalorder %s1662_s14, %s1658_s13 }
   0x9   : > { %p48_p2 = scmp.eq.s32.totalorder %s1674_s17, 0  ;;  %p53_p3 = scmp.ne.s32.totalorder %s1658_s13, %s1654_s12 }
   0xa   : > { %s2189_s20 = smov (%p33_p0, %s31_s20), 0  ;;  %p54_p5 = scmp.eq.s32.totalorder %s1385_s18, 0 }
   0xb   : > { %p1744_p4 = por %p48_p2, %p47_p1  ;;  %s35_s23 = ssub.s32 %s1670_s16, %s2189_s20 }
   0xc   : > { %p121_p6 = scmp.eq.s32.totalorder %s1385_s18, 1  ;;  %p38_p7 = scmp.eq.s32.totalorder %s35_s23, 0 }
   0xd   : > { %p1750_p8 = por %p54_p5, %p53_p3  ;;  %p127_p10 = scmp.eq.s32.totalorder %s1386_s19, 1 }
   0xe   : > { %p1754_p9 = por %p121_p6, %p47_p1  ;;  %p1505_p13 = scmp.lt.s32.totalorder %s1674_s17, 2 }
   0xf   : > { %s1759_s26 = scalar_select %p38_p7, %s1662_s14, %s40_s21  }
  0x10   : > { %s2174_s25 = scalar_select %p1754_p9, 1, 0 }
  0x11   : > { %p1761_p11 = por %p127_p10, %p53_p3  ;;  %s153_s28 = sand.u32 1, %s1662_s14  }
  0x12   : > { %s1389_s29 = sshll.u32 %s153_s28, 8  ;;  %s1459_s30 = sshll.u32 %s1670_s16, 12 }
  0x13   : > { %s2175_s27 = scalar_select %p1761_p11, 1, 0 }
  0x14   : > { %s1772_s6 = scalar_lea.hbm %s2167_s0, %s1459_s30  ;;  %s157_s7 = scalar_lea.vmem [#allocation2], %s1389_s29 }
  0x15   : > { %s166_s8 = sshll.u32 %s157_s7, 4  ;;  %p1778_p0 = pnand %p1505_p13, %p1744_p4  ;;  %s1774_s8 = int_to_ptr.vmem [resolvable:$true] %s166_s8 }
  0x16   : > { %s1783_s10 = scalar_lea.sflag [#allocation3], %s153_s28  ;;  %s1562_s11 = scalar_lea.hbm %s1772_s6, 4096 }
  0x17   : > { %p1563_p2 = scmp.ne.s32.totalorder %s1772_s6, %s1562_s11  ;;  %p1564_p3 = pneg %p1778_p0 }
  0x18   : > { %s1567_s21 = scalar_lea.hbm %s2167_s0, 8192  ;;  %p1568_p4 = scmp.lt.u32.totalorder %s1772_s6, %s2167_s0 }
  0x19   : > { %p1565_p5 = pnand %p1564_p3, %p1563_p2  ;;  %p1569_p7 = scmp.lt.u32.totalorder %s1567_s21, %s1562_s11 }
  0x1a   : > { %p1571_p13 = scmp.lt.u32.totalorder %s1562_s11, %s1772_s6 }
  0x1b   : > { %p1566_p6 = pneg %p1565_p5  ;;  %p1570_p10 = por %p1569_p7, %p1568_p4 }
  0x1d   : > { %p1572_p12 = por %p1571_p13, %p1570_p10 }
  0x1f   : > { %p1573_p1 = pnand %p1572_p12, %p1566_p6 }
  0x21   : > { %1576 = shalt.err (!%p1573_p1)
}
  0x22   : > { %s1577_s28 = scalar_lea.vmem %s1774_s8, 4096  ;;  %s1676_s29 = smov [#allocation2]  }
  0x23   : > { %p1578_p2 = scmp.ne.s32.totalorder %s1774_s8, %s1577_s28  ;;  %s1582_s30 = sshll.u32 %s1676_s29, 4  ;;  %s1583_s30 = int_to_ptr.vmem [resolvable:$false] %s1582_s30 }
  0x24   : > { %s1584_s4 = scalar_lea.vmem %s1583_s30, 8192  ;;  %p1585_p9 = scmp.lt.s32.totalorder %s1774_s8, %s1583_s30 }
  0x25   : > { %p1580_p5 = pnand %p1578_p2, %p1564_p3  ;;  %p1586_p4 = scmp.lt.s32.totalorder %s1584_s4, %s1577_s28 }
  0x27   : > { %p1581_p11 = pneg %p1580_p5  ;;  %p1587_p7 = por %p1586_p4, %p1585_p9 }
  0x29   : > { %p1588_p10 = pnand %p1587_p7, %p1581_p11 }
  0x2b   : > { %1591 = shalt.err (!%p1588_p10)
}
  0x2c   : > { %s1677_s5 = smov 2048   ;;  %s1678_s7 = smov 128  }
  0x2d   : > { %1500 = dma.hbm_to_vmem [thread:$0]  (!%p1778_p0), %s1772_s6, 4096, %s1774_s8, %s1783_s10, %s1677_s5, %s1677_s5, %s1678_s7  }
  0x2e   : > { %p174_p12 = scmp.lt.s32.totalorder %s1674_s17, 3  ;;  %p2177_p1 = scmp.ge.s32.totalorder %s1674_s17, 1 }
  0x30   : > { %p175_p3 = pnand %p2177_p1, %p174_p12 }
  0x31   : > { %s1815_s11 = sand.u32 (!%p175_p3), 1, %s1658_s13  }
  0x32   : > { %178 = sbr.rel (%p175_p3) target bundleno = 382 (0x17e), region = 32  ;;  %s1393_s18 = sshll.u32 (!%p175_p3), %s1815_s11, 8 }
  0x33   : > { %s181_s19 = scalar_lea.sflag (!%p175_p3), [#allocation3], %s1815_s11  ;;  %s1819_s21 = scalar_lea.vmem (!%p175_p3), [#allocation2], %s1393_s18 }
  0x39   : > { %1645 = dma.done.wait (%p1750_p8), %s181_s19, 4096  }
  0x3a   : > { %1647 = vsyncadd (%p1750_p8), %s181_s19, 4294963200  ;;  %v1679_v0 = vmov 0.0   ;;  %v1680_v1 = vmov 0   ;;  %v218_v2 = vld [vmem:[%s1819_s21 + $0x8] sm:$0xff]  ;;  %v220_v4 = vld [vmem:[%s1819_s21 + $0x18] sm:$0xff]  ;;  %vm245_vm0 = vcmask 130048  }
  0x3b   : > { %322 = vmatprep.mubr.f32.mxu0 %v1679_v0  ;;  %411 = vmatprep.mubr.f32.mxu1 %v1679_v0  ;;  %v222_v3 = vld [vmem:[%s1819_s21 + $0x88] sm:$0xff]  ;;  %v224_v6 = vld [vmem:[%s1819_s21 + $0x98] sm:$0xff]  ;;  %v217_v7 = vld [vmem:[%s1819_s21] sm:$0xff]  ;;  %s1460_s8 = sshll.u32 %s1666_s15, 8  ;;  %s1285_s28 = scalar_lea.sflag [#allocation4], %s1815_s11 }
  0x3c   : > { %1560 = vset.pattern.permute.xlu0 %v1680_v1  ;;  %1561 = vset.pattern.permute.xlu1 %v1680_v1  ;;  %v1461_v5 = vpack.c.bf16 %v222_v3, %v218_v2  ;;  %v221_v8 = vld [vmem:[%s1819_s21 + $0x80] sm:$0xff]  ;;  %v1465_v9 = vpack.c.bf16 %v224_v6, %v220_v4  ;;  %v219_v11 = vld [vmem:[%s1819_s21 + $0x10] sm:$0xff]  ;;  %v1404_v15 = vld [vmem:[%s1819_s21 + $0x28] sm:$0xff]  ;;  %s2115_s23 = scalar_lea.hbm %s2170_s3, %s1460_s8  ;;  %p2180_p9 = scmp.ne.s32.totalorder %s2174_s25, 0 }
  0x3d   : > { %v1463_v10 = vpack.c.bf16 %v221_v8, %v217_v7  ;;  %v223_v12 = vld [vmem:[%s1819_s21 + $0x90] sm:$0xff]  ;;  %v1838_v13 = vld [vmem:[%s2168_s1] sm:$0xff]  ;;  %v1408_v16 = vld [vmem:[%s1819_s21 + $0xa8] sm:$0xff]  ;;  %s1682_s15 = smov [#allocation5]  }
  0x3e   : > { %1462 = vmatprep.subr.bf16.mxu0 %v1461_v5  ;;  %v1467_v14 = vpack.c.bf16 %v223_v12, %v219_v11  ;;  %v1406_v17 = vld [vmem:[%s1819_s21 + $0x38] sm:$0xff]  ;;  %1466 = vmatprep.subr.bf16.mxu1 %v1465_v9  ;;  %v1469_v18 = vpack.c.bf16 %v1408_v16, %v1404_v15  ;;  %v1403_v20 = vld [vmem:[%s1819_s21 + $0x20] sm:$0xff]  ;;  %v1405_v24 = vld [vmem:[%s1819_s21 + $0x30] sm:$0xff]  ;;  %s1596_s30 = sshll.u32 %s1682_s15, 4  ;;  %s1597_s30 = int_to_ptr.vmem [resolvable:$false] %s1596_s30 }
  0x3f   : > { %1464 = vmatpush1.bf16.msra.mxu0 %v1463_v10  ;;  %v1410_v19 = vld [vmem:[%s1819_s21 + $0xb8] sm:$0xff]  ;;  %v1407_v21 = vld [vmem:[%s1819_s21 + $0xa0] sm:$0xff]  ;;  %v1409_v25 = vld [vmem:[%s1819_s21 + $0xb0] sm:$0xff]  ;;  %s1598_s4 = scalar_lea.vmem %s1597_s30, 512 }
  0x40   : > { %1468 = vmatpush1.bf16.msra.mxu1 %v1467_v14  ;;  %v1473_v22 = vpack.c.bf16 %v1410_v19, %v1406_v17  ;;  %v1471_v23 = vpack.c.bf16 %v1407_v21, %v1403_v20  ;;  %1470 = vmatprep.subr.bf16.mxu0 %v1469_v18  ;;  %v1475_v26 = vpack.c.bf16 %v1409_v25, %v1405_v24  ;;  %v1421_v27 = vld [vmem:[%s1819_s21 + $0x48] sm:$0xff]  ;;  %v1423_v29 = vld [vmem:[%s1819_s21 + $0x58] sm:$0xff]  ;;  %v1871_v34 = vld [vmem:[%s2168_s1 + $0x10] sm:$0xff] }
  0x41   : > { %v1425_v28 = vld [vmem:[%s1819_s21 + $0xc8] sm:$0xff]  ;;  %v1427_v30 = vld [vmem:[%s1819_s21 + $0xd8] sm:$0xff]  ;;  %v213_v35 = vld [vmem:[%s2169_s2] sm:$0xff] }
  0x42   : > { %1395 = vmatmul.mubr.msk.f32.vlgmr.msra.gmra.mrb[0].mxu0 %vm245_vm0, %v1838_v13  ;;  %1474 = vmatprep.subr.bf16.mxu1 %v1473_v22  ;;  %v1859_v31 = vld [vmem:[%s2168_s1 + $0x8] sm:$0xff]  ;;  %v1477_v32 = vpack.c.bf16 %v1425_v28, %v1421_v27  ;;  %v1481_v33 = vpack.c.bf16 %v1427_v30, %v1423_v29  ;;  %v215_v36 = vld [vmem:[%s2169_s2 + $0x10] sm:$0xff]  ;;  %v216_v38 = vld [vmem:[%s2169_s2 + $0x18] sm:$0xff]  ;;  %v1681_v22 = vmov 1966171168   ;;  %v485_v29 = vlaneseq }
  0x43   : > { %1399 = vmatmul.mubr.msk.f32.vlgmr.msra.gmra.mrb[0].mxu1 %vm245_vm0, %v1838_v13  ;;  %1472 = vmatpush1.bf16.msra.mxu0 %v1471_v23  ;;  %v214_v37 = vld [vmem:[%s2169_s2 + $0x8] sm:$0xff]  ;;  %v1894_v39 = vld [vmem:[%s2168_s1 + $0x18] sm:$0xff]  ;;  %v1420_v40 = vld [vmem:[%s1819_s21 + $0x40] sm:$0xff]  ;;  %v483_v23 = vunpack.c.l.s4 %v1681_v22 }
  0x44   : > { %1476 = vmatpush1.bf16.msra.mxu1 %v1475_v26  ;;  %328 = vmatprep.mubr.f32.mxu0 %v1679_v0  ;;  %v1424_v41 = vld [vmem:[%s1819_s21 + $0xc0] sm:$0xff]  ;;  %v1422_v42 = vld [vmem:[%s1819_s21 + $0x50] sm:$0xff]  ;;  %v1438_v44 = vld [vmem:[%s1819_s21 + $0x68] sm:$0xff]  ;;  %vm2029_vm1 = vcmp.lt.s32.totalorder %v485_v29, 512 }
  0x45   : > { %417 = vmatprep.mubr.f32.mxu1 %v1679_v0  ;;  %1478 = vmatprep.subr.bf16.mxu0 %v1477_v32  ;;  %v1426_v43 = vld [vmem:[%s1819_s21 + $0xd0] sm:$0xff]  ;;  %v1442_v45 = vld [vmem:[%s1819_s21 + $0xe8] sm:$0xff]  ;;  %v1479_v46 = vpack.c.bf16 %v1424_v41, %v1420_v40  ;;  %v1440_v47 = vld [vmem:[%s1819_s21 + $0x78] sm:$0xff] }
  0x46   : > { %1396 = vmatmul.mubr.msk.f32.gmra.mrb[2].mxu0 %vm245_vm0, %v1859_v31  ;;  %1482 = vmatprep.subr.bf16.mxu1 %v1481_v33  ;;  %v1444_v48 = vld [vmem:[%s1819_s21 + $0xf8] sm:$0xff]  ;;  %v1483_v49 = vpack.c.bf16 %v1426_v43, %v1422_v42  ;;  %v1485_v50 = vpack.c.bf16 %v1442_v45, %v1438_v44  ;;  %v1437_v52 = vld [vmem:[%s1819_s21 + $0x60] sm:$0xff]  ;;  %v1439_v54 = vld [vmem:[%s1819_s21 + $0x70] sm:$0xff]  ;;  %v484_v42 = vunpack.c.0.s8 %v483_v23  ;;  %v486_v43 = vshrl.u32 %v485_v29, 7 }
  0x47   : > { %1400 = vmatmul.mubr.msk.f32.gmra.mrb[2].mxu1 %vm245_vm0, %v1859_v31  ;;  %334 = vmatprep.mubr.f32.mxu0 %v1679_v0  ;;  %v1489_v51 = vpack.c.bf16 %v1444_v48, %v1440_v47  ;;  %v1441_v53 = vld [vmem:[%s1819_s21 + $0xe0] sm:$0xff]  ;;  %v1443_v55 = vld [vmem:[%s1819_s21 + $0xf0] sm:$0xff]  ;;  %s1394_s21 = sshll.u32 %s1815_s11, 4 }
  0x48   : > { %423 = vmatprep.mubr.f32.mxu1 %v1679_v0  ;;  %227 = vperm.xlu0 %1560, %v213_v35   ;;  %v1487_v56 = vpack.c.bf16 %v1441_v53, %v1437_v52  ;;  %v1491_v57 = vpack.c.bf16 %v1443_v55, %v1439_v54  ;;  %s2058_s6 = scalar_lea.vmem [#allocation5], %s1394_s21 }
  0x49   : > { %237 = vperm.xlu1 %1561, %v215_v36   ;;  %s1301_s9 = sshll.u32 %s2058_s6, 4  ;;  %s2117_s9 = int_to_ptr.vmem [resolvable:$true] %s1301_s9 }
  0x4a   : > { %1397 = vmatmul.mubr.msk.f32.gmra.mrb[4].mxu0 %vm245_vm0, %v1871_v34  ;;  %s1592_s29 = scalar_lea.vmem %s2117_s9, 256  ;;  %p1599_p6 = scmp.lt.s32.totalorder %s2117_s9, %s1597_s30 }
  0x4b   : > { %1401 = vmatmul.mubr.msk.f32.gmra.mrb[4].mxu1 %vm245_vm0, %v1871_v34  ;;  %340 = vmatprep.mubr.f32.mxu0 %v1679_v0  ;;  %p1593_p8 = scmp.ne.s32.totalorder %s2117_s9, %s1592_s29  ;;  %p1600_p13 = scmp.lt.s32.totalorder %s1598_s4, %s1592_s29 }
  0x4c   : > { %429 = vmatprep.mubr.f32.mxu1 %v1679_v0  ;;  %232 = vperm.xlu0 %1560, %v214_v37  }
  0x4d   : > { %242 = vperm.xlu1 %1561, %v216_v38   ;;  %p1594_p11 = pnand %p1593_p8, %p2180_p9  ;;  %p1601_p2 = por %p1600_p13, %p1599_p6 }
  0x4e   : > { %1398 = vmatmul.mubr.msk.f32.gmra.mrb[6].mxu0 %vm245_vm0, %v1894_v39 }
  0x4f   : > { %1402 = vmatmul.mubr.msk.f32.gmra.mrb[6].mxu1 %vm245_vm0, %v1894_v39  ;;  %583 = vmatprep.mubr.f32.mxu0 %v1679_v0  ;;  %p1595_p0 = pneg %p1594_p11 }
  0x50   : > { %672 = vmatprep.mubr.f32.mxu1 %v1679_v0 }
  0x51   : > { %p1602_p5 = pnand %p1601_p2, %p1595_p0 }
  0x52   : > { %1411 = vmatmul.mubr.msk.f32.vlgmr.msra.gmra.mrb[8].mxu0 %vm245_vm0, %v1838_v13 }
  0x53   : > { %1415 = vmatmul.mubr.msk.f32.vlgmr.msra.gmra.mrb[8].mxu1 %vm245_vm0, %v1838_v13  ;;  %1480 = vmatpush1.bf16.msra.mxu0 %v1479_v46 }
  0x54   : > { %1484 = vmatpush1.bf16.msra.mxu1 %v1483_v49  ;;  %589 = vmatprep.mubr.f32.mxu0 %v1679_v0 }
  0x55   : > { %678 = vmatprep.mubr.f32.mxu1 %v1679_v0  ;;  %1486 = vmatprep.subr.bf16.mxu0 %v1485_v50 }
  0x56   : > { %1412 = vmatmul.mubr.msk.f32.gmra.mrb[10].mxu0 %vm245_vm0, %v1859_v31  ;;  %1490 = vmatprep.subr.bf16.mxu1 %v1489_v51 }
  0x57   : > { %1416 = vmatmul.mubr.msk.f32.gmra.mrb[10].mxu1 %vm245_vm0, %v1859_v31  ;;  %595 = vmatprep.mubr.f32.mxu0 %v1679_v0 }
  0x58   : > { %684 = vmatprep.mubr.f32.mxu1 %v1679_v0 }
  0x5a   : > { %1413 = vmatmul.mubr.msk.f32.gmra.mrb[12].mxu0 %vm245_vm0, %v1871_v34 }
  0x5b   : > { %1417 = vmatmul.mubr.msk.f32.gmra.mrb[12].mxu1 %vm245_vm0, %v1871_v34  ;;  %601 = vmatprep.mubr.f32.mxu0 %v1679_v0 }
  0x5c   : > { %690 = vmatprep.mubr.f32.mxu1 %v1679_v0 }
  0x5e   : > { %1414 = vmatmul.mubr.msk.f32.gmra.mrb[14].mxu0 %vm245_vm0, %v1894_v39 }
  0x5f   : > { %1418 = vmatmul.mubr.msk.f32.gmra.mrb[14].mxu1 %vm245_vm0, %v1894_v39  ;;  %841 = vmatprep.mubr.f32.mxu0 %v1679_v0 }
  0x60   : > { %930 = vmatprep.mubr.f32.mxu1 %v1679_v0 }
  0x62   : > { %1428 = vmatmul.mubr.msk.f32.vlgmr.msra.gmra.mrb[16].mxu0 %vm245_vm0, %v1838_v13 }
  0x63   : > { %1432 = vmatmul.mubr.msk.f32.vlgmr.msra.gmra.mrb[16].mxu1 %vm245_vm0, %v1838_v13  ;;  %1488 = vmatpush1.bf16.msra.mxu0 %v1487_v56  ;;  %v2010_v56 = vsub.s32 %v484_v42, %v486_v43 }
  0x64   : > { %1492 = vmatpush1.bf16.msra.mxu1 %v1491_v57  ;;  %847 = vmatprep.mubr.f32.mxu0 %v1679_v0 }
  0x65   : > { %936 = vmatprep.mubr.f32.mxu1 %v1679_v0 }
  0x66   : > { %1429 = vmatmul.mubr.msk.f32.gmra.mrb[18].mxu0 %vm245_vm0, %v1859_v31 }
  0x67   : > { %1433 = vmatmul.mubr.msk.f32.gmra.mrb[18].mxu1 %vm245_vm0, %v1859_v31  ;;  %853 = vmatprep.mubr.f32.mxu0 %v1679_v0 }
  0x68   : > { %942 = vmatprep.mubr.f32.mxu1 %v1679_v0 }
  0x6a   : > { %1430 = vmatmul.mubr.msk.f32.gmra.mrb[20].mxu0 %vm245_vm0, %v1871_v34 }
  0x6b   : > { %1434 = vmatmul.mubr.msk.f32.gmra.mrb[20].mxu1 %vm245_vm0, %v1871_v34  ;;  %859 = vmatprep.mubr.f32.mxu0 %v1679_v0 }
  0x6c   : > { %948 = vmatprep.mubr.f32.mxu1 %v1679_v0 }
  0x6e   : > { %1431 = vmatmul.mubr.msk.f32.gmra.mrb[22].mxu0 %vm245_vm0, %v1894_v39 }
  0x6f   : > { %1435 = vmatmul.mubr.msk.f32.gmra.mrb[22].mxu1 %vm245_vm0, %v1894_v39  ;;  %1099 = vmatprep.mubr.f32.mxu0 %v1679_v0 }
  0x70   : > { %1188 = vmatprep.mubr.f32.mxu1 %v1679_v0 }
  0x72   : > { %1445 = vmatmul.mubr.msk.f32.vlgmr.msra.gmra.mrb[24].mxu0 %vm245_vm0, %v1838_v13 }
  0x73   : > { %1449 = vmatmul.mubr.msk.f32.vlgmr.msra.gmra.mrb[24].mxu1 %vm245_vm0, %v1838_v13  ;;  %1105 = vmatprep.mubr.f32.mxu0 %v1679_v0 }
  0x74   : > { %1194 = vmatprep.mubr.f32.mxu1 %v1679_v0 }
  0x76   : > { %1446 = vmatmul.mubr.msk.f32.gmra.mrb[26].mxu0 %vm245_vm0, %v1859_v31 }
  0x77   : > { %1450 = vmatmul.mubr.msk.f32.gmra.mrb[26].mxu1 %vm245_vm0, %v1859_v31  ;;  %1111 = vmatprep.mubr.f32.mxu0 %v1679_v0 }
  0x78   : > { %1200 = vmatprep.mubr.f32.mxu1 %v1679_v0 }
  0x7a   : > { %1447 = vmatmul.mubr.msk.f32.gmra.mrb[28].mxu0 %vm245_vm0, %v1871_v34 }
  0x7b   : > { %1451 = vmatmul.mubr.msk.f32.gmra.mrb[28].mxu1 %vm245_vm0, %v1871_v34  ;;  %1117 = vmatprep.mubr.f32.mxu0 %v1679_v0 }
  0x7c   : > { %1206 = vmatprep.mubr.f32.mxu1 %v1679_v0 }
  0x7e   : > { %1448 = vmatmul.mubr.msk.f32.gmra.mrb[30].mxu0 %vm245_vm0, %v1894_v39 }
  0x7f   : > { %1452 = vmatmul.mubr.msk.f32.gmra.mrb[30].mxu1 %vm245_vm0, %v1894_v39 }
  0xc7   : > { %v1985_v61 = vpop.permute.xlu0 %227 }
  0xc8   : > { %v1987_v1 = vpop.permute.xlu1 %237 }
  0xcb   : > { %v1989_v5 = vpop.permute.xlu0 %232 }
  0xcc   : > { %v1997_v15 = vpop.permute.xlu1 %242 }
 0x115   : > { %v324_v58 = vpop.f32.mrb[0].mxu0 }
 0x116   : > { %v413_v59 = vpop.f32.mrb[0].mxu1  ;;  %v326_v60 = vpop.f32.mrb[1].mxu0  ;;  %v325_v6 = vadd.f32 %v324_v58, %v1985_v61 }
 0x117   : > { %v415_v62 = vpop.f32.mrb[1].mxu1  ;;  %v327_v10 = vadd.f32 %v326_v60, %v1985_v61  ;;  %v414_v11 = vadd.f32 %v413_v59, %v1985_v61 }
 0x118   : > { %v416_v16 = vadd.f32 %v415_v62, %v1985_v61 }
 0x119   : > { %v330_v63 = vpop.f32.mrb[2].mxu0 }
 0x11a   : > { %v419_v2 = vpop.f32.mrb[2].mxu1  ;;  %v332_v3 = vpop.f32.mrb[3].mxu0  ;;  %v331_v25 = vadd.f32 %v330_v63, %v1989_v5 }
 0x11b   : > { %v421_v4 = vpop.f32.mrb[3].mxu1  ;;  %v333_v30 = vadd.f32 %v332_v3, %v1989_v5  ;;  %v420_v31 = vadd.f32 %v419_v2, %v1989_v5 }
 0x11c   : > { %v422_v35 = vadd.f32 %v421_v4, %v1989_v5 }
 0x11d   : > { %v336_v0 = vpop.f32.mrb[4].mxu0 }
 0x11e   : > { %v337_v7 = vadd.f32 %v336_v0, %v1987_v1  ;;  %v425_v8 = vpop.f32.mrb[4].mxu1  ;;  %v338_v9 = vpop.f32.mrb[5].mxu0 }
 0x11f   : > { %v426_v12 = vadd.f32 %v425_v8, %v1987_v1  ;;  %v339_v13 = vadd.f32 %v338_v9, %v1987_v1  ;;  %v427_v14 = vpop.f32.mrb[5].mxu1 }
 0x120   : > { %v436_v17 = vmax.f32 %v325_v6, %v337_v7  ;;  %v428_v18 = vadd.f32 %v427_v14, %v1987_v1 }
 0x121   : > { %v438_v19 = vmax.f32 %v414_v11, %v426_v12  ;;  %v437_v20 = vmax.f32 %v327_v10, %v339_v13  ;;  %v342_v21 = vpop.f32.mrb[6].mxu0 }
 0x122   : > { %v439_v24 = vmax.f32 %v416_v16, %v428_v18  ;;  %v343_v26 = vadd.f32 %v342_v21, %v1997_v15  ;;  %v431_v27 = vpop.f32.mrb[6].mxu1  ;;  %v344_v28 = vpop.f32.mrb[7].mxu0 }
 0x123   : > { %v432_v32 = vadd.f32 %v431_v27, %v1997_v15  ;;  %v345_v33 = vadd.f32 %v344_v28, %v1997_v15  ;;  %v433_v34 = vpop.f32.mrb[7].mxu1 }
 0x124   : > { %v440_v36 = vmax.f32 %v331_v25, %v343_v26  ;;  %v434_v37 = vadd.f32 %v433_v34, %v1997_v15 }
 0x125   : > { %v442_v38 = vmax.f32 %v420_v31, %v432_v32  ;;  %v441_v39 = vmax.f32 %v333_v30, %v345_v33  ;;  %v585_v40 = vpop.f32.mrb[8].mxu0 }
 0x126   : > { %v444_v41 = vadd.f32 %v440_v36, %v436_v17  ;;  %v443_v44 = vmax.f32 %v422_v35, %v434_v37  ;;  %v674_v45 = vpop.f32.mrb[8].mxu1  ;;  %v587_v46 = vpop.f32.mrb[9].mxu0  ;;  %v586_v58 = vadd.f32 %v585_v40, %v1985_v61 }
 0x127   : > { %v458_v47 = vadd.f32 %v442_v38, %v438_v19  ;;  %v451_v48 = vadd.f32 %v441_v39, %v437_v20  ;;  %v676_v49 = vpop.f32.mrb[9].mxu1  ;;  %v675_v2 = vadd.f32 %v674_v45, %v1985_v61  ;;  %v588_v3 = vadd.f32 %v587_v46, %v1985_v61 }
 0x128   : > { %v445_v50 = vrot.slane %v444_v41, 4  ;;  %v465_v51 = vadd.f32 %v443_v44, %v439_v24  ;;  %v677_v7 = vadd.f32 %v676_v49, %v1985_v61 }
 0x129   : > { %v459_v52 = vrot.slane %v458_v47, 4  ;;  %v452_v53 = vrot.slane %v451_v48, 4  ;;  %v591_v54 = vpop.f32.mrb[10].mxu0 }
 0x12a   : > { %v446_v55 = vadd.f32 %v445_v50, %v444_v41  ;;  %v466_v57 = vrot.slane %v465_v51, 4  ;;  %v680_v59 = vpop.f32.mrb[10].mxu1  ;;  %v593_v60 = vpop.f32.mrb[11].mxu0  ;;  %v592_v8 = vadd.f32 %v591_v54, %v1989_v5 }
 0x12b   : > { %v460_v62 = vadd.f32 %v459_v52, %v458_v47  ;;  %v453_v63 = vadd.f32 %v452_v53, %v451_v48  ;;  %v682_v4 = vpop.f32.mrb[11].mxu1  ;;  %v681_v11 = vadd.f32 %v680_v59, %v1989_v5  ;;  %v594_v12 = vadd.f32 %v593_v60, %v1989_v5 }
 0x12c   : > { %v447_v0 = vrot.slane %v446_v55, 2  ;;  %v467_v6 = vadd.f32 %v466_v57, %v465_v51  ;;  %v683_v17 = vadd.f32 %v682_v4, %v1989_v5 }
 0x12d   : > { %v461_v9 = vrot.slane %v460_v62, 2  ;;  %v454_v10 = vrot.slane %v453_v63, 2  ;;  %v597_v13 = vpop.f32.mrb[12].mxu0 }
 0x12e   : > { %v448_v14 = vadd.f32 %v447_v0, %v446_v55  ;;  %v468_v16 = vrot.slane %v467_v6, 2  ;;  %v598_v18 = vadd.f32 %v597_v13, %v1987_v1  ;;  %v686_v19 = vpop.f32.mrb[12].mxu1  ;;  %v599_v20 = vpop.f32.mrb[13].mxu0 }
 0x12f   : > { %v462_v21 = vadd.f32 %v461_v9, %v460_v62  ;;  %v455_v22 = vadd.f32 %v454_v10, %v453_v63  ;;  %v687_v23 = vadd.f32 %v686_v19, %v1987_v1  ;;  %v600_v24 = vadd.f32 %v599_v20, %v1987_v1  ;;  %v688_v25 = vpop.f32.mrb[13].mxu1 }
 0x130   : > { %v449_v26 = vrot.slane %v448_v14, 1  ;;  %v469_v27 = vadd.f32 %v468_v16, %v467_v6  ;;  %v697_v28 = vmax.f32 %v586_v58, %v598_v18  ;;  %v689_v30 = vadd.f32 %v688_v25, %v1987_v1 }
 0x131   : > { %v463_v31 = vrot.slane %v462_v21, 1  ;;  %v456_v32 = vrot.slane %v455_v22, 1  ;;  %v699_v33 = vmax.f32 %v675_v2, %v687_v23  ;;  %v698_v34 = vmax.f32 %v588_v3, %v600_v24  ;;  %v603_v35 = vpop.f32.mrb[14].mxu0 }
 0x132   : > { %v450_v36 = vadd.f32 %v449_v26, %v448_v14  ;;  %v470_v37 = vrot.slane %v469_v27, 1  ;;  %v700_v38 = vmax.f32 %v677_v7, %v689_v30  ;;  %v604_v39 = vadd.f32 %v603_v35, %v1997_v15  ;;  %v692_v40 = vpop.f32.mrb[14].mxu1  ;;  %v605_v41 = vpop.f32.mrb[15].mxu0 }
 0x133   : > { %v464_v42 = vadd.f32 %v463_v31, %v462_v21  ;;  %v457_v43 = vadd.f32 %v456_v32, %v455_v22  ;;  %v693_v44 = vadd.f32 %v692_v40, %v1997_v15  ;;  %v606_v45 = vadd.f32 %v605_v41, %v1997_v15  ;;  %v694_v46 = vpop.f32.mrb[15].mxu1 }
 0x134   : > { %v472_v47 = vmul.f32 0.0625, %v450_v36  ;;  %v471_v48 = vadd.f32 %v470_v37, %v469_v27  ;;  %v701_v49 = vmax.f32 %v592_v8, %v604_v39  ;;  %v695_v50 = vadd.f32 %v694_v46, %v1997_v15 }
 0x135   : > { %v474_v51 = vmul.f32 0.0625, %v464_v42  ;;  %v473_v52 = vmul.f32 0.0625, %v457_v43  ;;  %v703_v53 = vmax.f32 %v681_v11, %v693_v44  ;;  %v702_v54 = vmax.f32 %v594_v12, %v606_v45  ;;  %v843_v55 = vpop.f32.mrb[16].mxu0 }
 0x136   : > { %v475_v57 = vmul.f32 0.0625, %v471_v48  ;;  %v705_v58 = vadd.f32 %v701_v49, %v697_v28  ;;  %v704_v59 = vmax.f32 %v683_v17, %v695_v50  ;;  %v932_v60 = vpop.f32.mrb[16].mxu1  ;;  %v845_v62 = vpop.f32.mrb[17].mxu0  ;;  %v2034_v9 = vadd.f32 %v843_v55, %v1985_v61 }
 0x137   : > { %v480_v63 = vcombine.low %v472_v47, %v473_v52  ;;  %v719_v2 = vadd.f32 %v703_v53, %v699_v33  ;;  %v712_v3 = vadd.f32 %v702_v54, %v698_v34  ;;  %v934_v4 = vpop.f32.mrb[17].mxu1  ;;  %v2038_v13 = vadd.f32 %v932_v60, %v1985_v61 }
 0x138   : > { %v481_v6 = vcombine.low %v474_v51, %v475_v57  ;;  %v706_v7 = vrot.slane %v705_v58, 4  ;;  %v726_v8 = vadd.f32 %v704_v59, %v700_v38  ;;  %v2042_v18 = vadd.f32 %v845_v62, %v1985_v61 }
 0x139   : > { %v488_v10 = vrot.slane %v480_v63, %v2010_v56  ;;  %v720_v11 = vrot.slane %v719_v2, 4  ;;  %v713_v12 = vrot.slane %v712_v3, 4  ;;  %v849_v14 = vpop.f32.mrb[18].mxu0  ;;  %v2046_v23 = vadd.f32 %v934_v4, %v1985_v61 }
 0x13a   : > { %v495_v29 = vrot.slane %v481_v6, %v2010_v56  ;;  %v707_v16 = vadd.f32 %v706_v7, %v705_v58  ;;  %v727_v17 = vrot.slane %v726_v8, 4  ;;  %v938_v19 = vpop.f32.mrb[18].mxu1  ;;  %v851_v20 = vpop.f32.mrb[19].mxu0  ;;  %v850_v24 = vadd.f32 %v849_v14, %v1989_v5 }
 0x13b   : > { %v721_v21 = vadd.f32 %v720_v11, %v719_v2  ;;  %v714_v22 = vadd.f32 %v713_v12, %v712_v3  ;;  %v940_v25 = vpop.f32.mrb[19].mxu1  ;;  %v939_v30 = vadd.f32 %v938_v19, %v1989_v5  ;;  %v852_v33 = vadd.f32 %v851_v20, %v1989_v5 }
 0x13c   : > { %v496_v26 = vcombine.low %v488_v10, %v495_v29  ;;  %v708_v27 = vrot.slane %v707_v16, 2  ;;  %v728_v28 = vadd.f32 %v727_v17, %v726_v8  ;;  %v941_v34 = vadd.f32 %v940_v25, %v1989_v5 }
 0x13d   : > { %v722_v31 = vrot.slane %v721_v21, 2  ;;  %v715_v32 = vrot.slane %v714_v22, 2  ;;  %v855_v35 = vpop.f32.mrb[20].mxu0 }
 0x13e   : > { %v503_v36 = vrot.slane %v496_v26, %v2010_v56  ;;  %v709_v37 = vadd.f32 %v708_v27, %v707_v16  ;;  %v729_v38 = vrot.slane %v728_v28, 2  ;;  %v856_v39 = vadd.f32 %v855_v35, %v1987_v1  ;;  %v944_v40 = vpop.f32.mrb[20].mxu1  ;;  %v857_v41 = vpop.f32.mrb[21].mxu0 }
 0x13f   : > { %v723_v42 = vadd.f32 %v722_v31, %v721_v21  ;;  %v716_v43 = vadd.f32 %v715_v32, %v714_v22  ;;  %v945_v44 = vadd.f32 %v944_v40, %v1987_v1  ;;  %v858_v45 = vadd.f32 %v857_v41, %v1987_v1  ;;  %v946_v46 = vpop.f32.mrb[21].mxu1 }
 0x140   : > { %v710_v47 = vrot.slane %v709_v37, 1  ;;  %v730_v48 = vadd.f32 %v729_v38, %v728_v28  ;;  %v955_v49 = vmax.f32 %v2034_v9, %v856_v39  ;;  %v947_v50 = vadd.f32 %v946_v46, %v1987_v1  ;;  %509 = vst.msk [vmem:[%s2058_s6] sm:$0xf] %vm2029_vm1, %v503_v36 }
 0x141   : > { %v724_v51 = vrot.slane %v723_v42, 1  ;;  %v717_v52 = vrot.slane %v716_v43, 1  ;;  %v957_v53 = vmax.f32 %v2038_v13, %v945_v44  ;;  %v956_v54 = vmax.f32 %v2042_v18, %v858_v45  ;;  %v861_v55 = vpop.f32.mrb[22].mxu0 }
 0x142   : > { %v711_v57 = vadd.f32 %v710_v47, %v709_v37  ;;  %v731_v58 = vrot.slane %v730_v48, 1  ;;  %v958_v59 = vmax.f32 %v2046_v23, %v947_v50  ;;  %v862_v60 = vadd.f32 %v861_v55, %v1997_v15  ;;  %v950_v62 = vpop.f32.mrb[22].mxu1  ;;  %v863_v63 = vpop.f32.mrb[23].mxu0 }
 0x143   : > { %v725_v2 = vadd.f32 %v724_v51, %v723_v42  ;;  %v718_v3 = vadd.f32 %v717_v52, %v716_v43  ;;  %v951_v4 = vadd.f32 %v950_v62, %v1997_v15  ;;  %v864_v6 = vadd.f32 %v863_v63, %v1997_v15  ;;  %v952_v7 = vpop.f32.mrb[23].mxu1 }
 0x144   : > { %v733_v8 = vmul.f32 0.0625, %v711_v57  ;;  %v732_v9 = vadd.f32 %v731_v58, %v730_v48  ;;  %v959_v10 = vmax.f32 %v850_v24, %v862_v60  ;;  %v953_v11 = vadd.f32 %v952_v7, %v1997_v15 }
 0x145   : > { %v735_v12 = vmul.f32 0.0625, %v725_v2  ;;  %v734_v13 = vmul.f32 0.0625, %v718_v3  ;;  %v961_v14 = vmax.f32 %v939_v30, %v951_v4  ;;  %v960_v29 = vmax.f32 %v852_v33, %v864_v6  ;;  %v1101_v16 = vpop.f32.mrb[24].mxu0 }
 0x146   : > { %v736_v17 = vmul.f32 0.0625, %v732_v9  ;;  %v963_v18 = vadd.f32 %v959_v10, %v955_v49  ;;  %v962_v19 = vmax.f32 %v941_v34, %v953_v11  ;;  %v1190_v20 = vpop.f32.mrb[24].mxu1  ;;  %v1103_v21 = vpop.f32.mrb[25].mxu0  ;;  %v2071_v24 = vadd.f32 %v1101_v16, %v1985_v61 }
 0x147   : > { %v741_v22 = vcombine.low %v733_v8, %v734_v13  ;;  %v977_v23 = vadd.f32 %v961_v14, %v957_v53  ;;  %v970_v25 = vadd.f32 %v960_v29, %v956_v54  ;;  %v1192_v26 = vpop.f32.mrb[25].mxu1  ;;  %v2075_v35 = vadd.f32 %v1190_v20, %v1985_v61 }
 0x148   : > { %v742_v27 = vcombine.low %v735_v12, %v736_v17  ;;  %v964_v28 = vrot.slane %v963_v18, 4  ;;  %v984_v31 = vadd.f32 %v962_v19, %v958_v59  ;;  %v2079_v39 = vadd.f32 %v1103_v21, %v1985_v61 }
 0x149   : > { %v749_v32 = vrot.slane %v741_v22, %v2010_v56  ;;  %v978_v30 = vrot.slane %v977_v23, 4  ;;  %v971_v33 = vrot.slane %v970_v25, 4  ;;  %v1107_v34 = vpop.f32.mrb[26].mxu0  ;;  %v1193_v44 = vadd.f32 %v1192_v26, %v1985_v61 }
 0x14a   : > { %v756_v36 = vrot.slane %v742_v27, %v2010_v56  ;;  %v965_v37 = vadd.f32 %v964_v28, %v963_v18  ;;  %v985_v38 = vrot.slane %v984_v31, 4  ;;  %v1196_v40 = vpop.f32.mrb[26].mxu1  ;;  %v1109_v41 = vpop.f32.mrb[27].mxu0  ;;  %v1108_v45 = vadd.f32 %v1107_v34, %v1989_v5 }
 0x14b   : > { %v979_v42 = vadd.f32 %v978_v30, %v977_v23  ;;  %v972_v43 = vadd.f32 %v971_v33, %v970_v25  ;;  %v1198_v46 = vpop.f32.mrb[27].mxu1  ;;  %v1197_v50 = vadd.f32 %v1196_v40, %v1989_v5  ;;  %v1110_v53 = vadd.f32 %v1109_v41, %v1989_v5 }
 0x14c   : > { %v757_v47 = vcombine.low %v749_v32, %v756_v36  ;;  %v966_v48 = vrot.slane %v965_v37, 2  ;;  %v986_v49 = vadd.f32 %v985_v38, %v984_v31  ;;  %v1199_v54 = vadd.f32 %v1198_v46, %v1989_v5 }
 0x14d   : > { %v980_v51 = vrot.slane %v979_v42, 2  ;;  %v973_v52 = vrot.slane %v972_v43, 2  ;;  %v1113_v55 = vpop.f32.mrb[28].mxu0 }
 0x14e   : > { %v764_v57 = vrot.slane %v757_v47, %v2010_v56  ;;  %v967_v58 = vadd.f32 %v966_v48, %v965_v37  ;;  %v987_v61 = vrot.slane %v986_v49, 2  ;;  %v1114_v59 = vadd.f32 %v1113_v55, %v1987_v1  ;;  %v1202_v60 = vpop.f32.mrb[28].mxu1  ;;  %v1115_v62 = vpop.f32.mrb[29].mxu0 }
 0x14f   : > { %v981_v63 = vadd.f32 %v980_v51, %v979_v42  ;;  %v974_v2 = vadd.f32 %v973_v52, %v972_v43  ;;  %v1203_v3 = vadd.f32 %v1202_v60, %v1987_v1  ;;  %v1116_v4 = vadd.f32 %v1115_v62, %v1987_v1  ;;  %v1204_v6 = vpop.f32.mrb[29].mxu1 }
 0x150   : > { %v968_v7 = vrot.slane %v967_v58, 1  ;;  %v988_v8 = vadd.f32 %v987_v61, %v986_v49  ;;  %v1213_v5 = vmax.f32 %v2071_v24, %v1114_v59  ;;  %v1205_v9 = vadd.f32 %v1204_v6, %v1987_v1  ;;  %1419 = vst.msk [vmem:[%s2058_s6 + $0x4] sm:$0xf] %vm2029_vm1, %v764_v57 }
 0x151   : > { %v982_v10 = vrot.slane %v981_v63, 1  ;;  %v975_v11 = vrot.slane %v974_v2, 1  ;;  %v1215_v12 = vmax.f32 %v2075_v35, %v1203_v3  ;;  %v1214_v13 = vmax.f32 %v2079_v39, %v1116_v4  ;;  %v1119_v14 = vpop.f32.mrb[30].mxu0 }
 0x152   : > { %v969_v29 = vadd.f32 %v968_v7, %v967_v58  ;;  %v989_v16 = vrot.slane %v988_v8, 1  ;;  %v1216_v17 = vmax.f32 %v1193_v44, %v1205_v9  ;;  %v1120_v18 = vadd.f32 %v1119_v14, %v1997_v15  ;;  %v1208_v19 = vpop.f32.mrb[30].mxu1  ;;  %v1121_v20 = vpop.f32.mrb[31].mxu0 }
 0x153   : > { %v983_v21 = vadd.f32 %v982_v10, %v981_v63  ;;  %v976_v22 = vadd.f32 %v975_v11, %v974_v2  ;;  %v1209_v1 = vadd.f32 %v1208_v19, %v1997_v15  ;;  %v1122_v23 = vadd.f32 %v1121_v20, %v1997_v15  ;;  %v1210_v25 = vpop.f32.mrb[31].mxu1 }
 0x154   : > { %v991_v26 = vmul.f32 0.0625, %v969_v29  ;;  %v990_v27 = vadd.f32 %v989_v16, %v988_v8  ;;  %v1217_v28 = vmax.f32 %v1108_v45, %v1120_v18  ;;  %v1211_v31 = vadd.f32 %v1210_v25, %v1997_v15 }
 0x155   : > { %v993_v24 = vmul.f32 0.0625, %v983_v21  ;;  %v992_v32 = vmul.f32 0.0625, %v976_v22  ;;  %v1219_v30 = vmax.f32 %v1197_v50, %v1209_v1  ;;  %v1218_v33 = vmax.f32 %v1110_v53, %v1122_v23 }
 0x156   : > { %v994_v35 = vmul.f32 0.0625, %v990_v27  ;;  %v1221_v34 = vadd.f32 %v1217_v28, %v1213_v5  ;;  %v1220_v36 = vmax.f32 %v1199_v54, %v1211_v31 }
 0x157   : > { %v999_v37 = vcombine.low %v991_v26, %v992_v32  ;;  %v1235_v38 = vadd.f32 %v1219_v30, %v1215_v12  ;;  %v1228_v39 = vadd.f32 %v1218_v33, %v1214_v13 }
 0x158   : > { %v1000_v40 = vcombine.low %v993_v24, %v994_v35  ;;  %v1222_v41 = vrot.slane %v1221_v34, 4  ;;  %v1242_v42 = vadd.f32 %v1220_v36, %v1216_v17 }
 0x159   : > { %v1007_v43 = vrot.slane %v999_v37, %v2010_v56  ;;  %v1236_v44 = vrot.slane %v1235_v38, 4  ;;  %v1229_v46 = vrot.slane %v1228_v39, 4 }
 0x15a   : > { %v1014_v45 = vrot.slane %v1000_v40, %v2010_v56  ;;  %v1223_v15 = vadd.f32 %v1222_v41, %v1221_v34  ;;  %v1243_v47 = vrot.slane %v1242_v42, 4 }
 0x15b   : > { %v1237_v48 = vadd.f32 %v1236_v44, %v1235_v38  ;;  %v1230_v49 = vadd.f32 %v1229_v46, %v1228_v39 }
 0x15c   : > { %v1015_v50 = vcombine.low %v1007_v43, %v1014_v45  ;;  %v1224_v51 = vrot.slane %v1223_v15, 2  ;;  %v1244_v52 = vadd.f32 %v1243_v47, %v1242_v42 }
 0x15d   : > { %v1238_v53 = vrot.slane %v1237_v48, 2  ;;  %v1231_v54 = vrot.slane %v1230_v49, 2 }
 0x15e   : > { %v1022_v55 = vrot.slane %v1015_v50, %v2010_v56  ;;  %v1225_v57 = vadd.f32 %v1224_v51, %v1223_v15  ;;  %v1245_v58 = vrot.slane %v1244_v52, 2 }
 0x15f   : > { %v1239_v61 = vadd.f32 %v1238_v53, %v1237_v48  ;;  %v1232_v59 = vadd.f32 %v1231_v54, %v1230_v49 }
 0x160   : > { %v1226_v60 = vrot.slane %v1225_v57, 1  ;;  %v1246_v62 = vadd.f32 %v1245_v58, %v1244_v52  ;;  %1436 = vst.msk [vmem:[%s2058_s6 + $0x8] sm:$0xf] %vm2029_vm1, %v1022_v55 }
 0x161   : > { %v1240_v63 = vrot.slane %v1239_v61, 1  ;;  %v1233_v2 = vrot.slane %v1232_v59, 1 }
 0x162   : > { %v1227_v3 = vadd.f32 %v1226_v60, %v1225_v57  ;;  %v1247_v4 = vrot.slane %v1246_v62, 1 }
 0x163   : > { %v1241_v6 = vadd.f32 %v1240_v63, %v1239_v61  ;;  %v1234_v7 = vadd.f32 %v1233_v2, %v1232_v59 }
 0x164   : > { %v1249_v8 = vmul.f32 0.0625, %v1227_v3  ;;  %v1248_v5 = vadd.f32 %v1247_v4, %v1246_v62 }
 0x165   : > { %v1251_v9 = vmul.f32 0.0625, %v1241_v6  ;;  %v1250_v10 = vmul.f32 0.0625, %v1234_v7 }
 0x166   : > { %v1252_v11 = vmul.f32 0.0625, %v1248_v5 }
 0x167   : > { %v1257_v12 = vcombine.low %v1249_v8, %v1250_v10 }
 0x168   : > { %v1258_v13 = vcombine.low %v1251_v9, %v1252_v11 }
 0x169   : > { %v1265_v14 = vrot.slane %v1257_v12, %v2010_v56 }
 0x16a   : > { %v1272_v29 = vrot.slane %v1258_v13, %v2010_v56 }
 0x16c   : > { %v1273_v16 = vcombine.low %v1265_v14, %v1272_v29 }
 0x16e   : > { %v1280_v17 = vrot.slane %v1273_v16, %v2010_v56 }
 0x170   : > { %1453 = vst.msk [vmem:[%s2058_s6 + $0xc] sm:$0xf] %vm2029_vm1, %v1280_v17 }
 0x171   : > { %1605 = shalt.err (!%p1602_p5)
}
 0x172   : > { %s1606_s11 = scalar_lea.hbm %s2115_s23, 256  ;;  %s1610_s18 = scalar_lea.hbm %s2170_s3, 512 }
 0x173   : > { %p1607_p4 = scmp.ne.s32.totalorder %s2115_s23, %s1606_s11  ;;  %p1611_p12 = scmp.lt.u32.totalorder %s2115_s23, %s2170_s3 }
 0x174   : > { %p1612_p1 = scmp.lt.u32.totalorder %s1610_s18, %s1606_s11  ;;  %p1614_p8 = scmp.lt.u32.totalorder %s1606_s11, %s2115_s23 }
 0x175   : > { %p1608_p7 = pnand %p1607_p4, %p2180_p9 }
 0x176   : > { %p1613_p3 = por %p1612_p1, %p1611_p12 }
 0x177   : > { %p1609_p10 = pneg %p1608_p7 }
 0x178   : > { %p1615_p11 = por %p1614_p8, %p1613_p3 }
 0x17a   : > { %p1616_p0 = pnand %p1615_p11, %p1609_p10 }
 0x17c   : > { %1619 = shalt.err (!%p1616_p0)
}
 0x17d   : > { %1495 = dma.vmem_to_hbm [thread:$0]  (%p2180_p9), %s2117_s9, 256, %s2115_s23, %s1285_s28  }
 0x17e PF: > { %s1313_s21 = sand.u32 1, %s1654_s12   ;;  %p2181_p6 = scmp.ne.s32.totalorder %s2175_s27, 0 }
 0x17f   : > { %p2182_p13 = scmp.ge.s32.totalorder %s1674_s17, 2  ;;  %s1314_s6 = scalar_lea.sflag [#allocation4], %s1313_s21 }
 0x181   : > { %p1502_p2 = pnand %p2182_p13, %p2181_p6 }
 0x183   : > { %1649 = dma.done.wait (!%p1502_p2), %s1314_s6, 256  }
 0x184   : > { %1651 = vsyncadd (!%p1502_p2), %s1314_s6, 4294967040  ;;  %s19_s17 = sadd.s32 1, %s1674_s17   ;;  %s2183_s12 = smov %s1658_s13 }
 0x185   : > { %p16_p5 = scmp.ge.s32.totalorder %s19_s17, 4   ;;  %s2184_s13 = smov %s1662_s14 }
 0x186   : > { %s2185_s14 = smov %s1759_s26  ;;  %s2186_s15 = smov %s1670_s16 }
 0x187   : > { %s2187_s16 = smov %s2189_s20  ;;  %18 = sbr.rel (!%p16_p5) target bundleno = 6 (0x6), region = 83 }
 0x18e   :  { %1319 = vsyncpa [#allocation3], 1 }
 0x18f   :  { %1321 = vsyncpa [#allocation3 + $0x1], 1 }
 0x190   :  { %1322 = vsyncpa [#allocation4], 1 }
 0x191   :  { %1324 = vsyncpa [#allocation4 + $0x1], 1 }

</bundles_post_ra>
